<compile_context>
chip_gen: v5e
topology: v5e:2x2
jax: 0.10.0
libtpu: 0.0.40
codegen_flags: <defaults>
</compile_context>

<pallas_src>
import functools

import jax
import jax.numpy as jnp
from jax.experimental import pallas as pl
from jax.experimental.pallas import tpu as pltpu


def _ca_kernel(x_ref, w1t_ref, b1_ref, w2t_ref, b2_ref, o_ref, *, inv_hw):
    # x_ref  : (TN, C, HWp)  spatial axis lane-dense (HWp % 128 == 0)
    # w1t_ref: (C,  Cr)      squeeze 1x1-conv weight, pre-transposed
    # b1_ref : (1,  Cr)
    # w2t_ref: (Cr, C)       excite 1x1-conv weight, pre-transposed
    # b2_ref : (1,  C)
    # o_ref  : (TN, C, HWp)
    x = x_ref[...].astype(jnp.float32)                          # (TN, C, HWp)

    # Global average pool over the spatial (lane) axis, f32 accumulation.
    # Zero padding beyond the real HW does not perturb the sum; inv_hw uses
    # the true spatial size.
    pooled = jnp.sum(x, axis=2) * inv_hw                        # (TN, C)

    # Channel-attention MLP on the whole block of pooled vectors: two
    # lane-dense matmuls instead of per-image (.,1)-column matmuls.
    z1 = jnp.dot(pooled, w1t_ref[...],
                 preferred_element_type=jnp.float32) + b1_ref[...]   # (TN, Cr)
    z1 = jnp.maximum(z1, 0.0)
    z2 = jnp.dot(z1, w2t_ref[...],
                 preferred_element_type=jnp.float32) + b2_ref[...]   # (TN, C)
    gate = 1.0 / (1.0 + jnp.exp(-z2))                           # sigmoid, (TN, C)

    # Channel-wise gate, broadcast along the spatial (lane) axis.
    o_ref[...] = (x * gate[:, :, None]).astype(o_ref.dtype)


def _vmem_budget_bytes():
    """Half the chip's VMEM (leaves headroom), capped at 96 MiB."""
    try:
        cap = pltpu.get_tpu_info().vmem_capacity_bytes
    except Exception:
        cap = 64 << 20          # conservative fallback (v7x-sized)
    return min(cap // 2, 96 << 20)


def _choose_tn(n, per_image_bytes, budget_bytes):
    """Batch images per block so the block is ~0.5-4 MiB and 2-in + 2-out
    pipeline buffers fit the VMEM budget on every generation."""
    target = min(4 << 20, max(budget_bytes // 8, per_image_bytes))
    tn = max(1, min(n, target // max(per_image_bytes, 1)))
    # Prefer >= 2 grid steps (keeps both v7x TensorCores busy) as long as the
    # halved block still amortizes per-step overhead (>= 512 KiB).
    if tn >= n and n > 1 and pl.cdiv(n, 2) * per_image_bytes >= (512 << 10):
        tn = pl.cdiv(n, 2)
    return tn


def ca_layer(x, w1, b1, w2, b2):
    """Forward of CALayer.  x: (N, C, H, W); w1: (C//8, C); w2: (C, C//8)."""
    N, C, H, W = x.shape
    Cr = w1.shape[0]
    HW = H * W
    HWp = ((HW + 127) // 128) * 128        # lane-dense (128-aligned) spatial

    x2 = x.reshape(N, C, HW)               # free reshape, keeps NCHW order
    if HWp != HW:
        x2 = jnp.pad(x2, ((0, 0), (0, 0), (0, HWp - HW)))

    itemsize = jnp.dtype(x.dtype).itemsize
    budget = _vmem_budget_bytes()
    tn = _choose_tn(N, C * HWp * itemsize, budget)
    grid = (pl.cdiv(N, tn),)

    kernel = functools.partial(_ca_kernel, inv_hw=1.0 / HW)

    cost = pl.CostEstimate(
        flops=2 * N * C * HW + 4 * N * C * Cr,
        transcendentals=N * C,
        bytes_accessed=2 * N * C * HW * itemsize,
    )

    out = pl.pallas_call(
        kernel,
        out_shape=jax.ShapeDtypeStruct((N, C, HWp), x.dtype),
        grid_spec=pltpu.PrefetchScalarGridSpec(
            num_scalar_prefetch=0,
            grid=grid,
            in_specs=[
                pl.BlockSpec((tn, C, HWp), lambda n: (n, 0, 0)),
                pl.BlockSpec((C, Cr), lambda n: (0, 0)),
                pl.BlockSpec((1, Cr), lambda n: (0, 0)),
                pl.BlockSpec((Cr, C), lambda n: (0, 0)),
                pl.BlockSpec((1, C), lambda n: (0, 0)),
            ],
            out_specs=pl.BlockSpec((tn, C, HWp), lambda n: (n, 0, 0)),
        ),
        compiler_params=pltpu.CompilerParams(
            dimension_semantics=("parallel",),
            vmem_limit_bytes=budget,
        ),
        cost_estimate=cost,
    )(x2, w1.T, b1.reshape(1, Cr), w2.T, b2.reshape(1, C))

    if HWp != HW:
        out = out[:, :, :HW]
    return out.reshape(N, C, H, W)


def _reference_ca(x, w1, b1, w2, b2):
    """Pure-JAX reference with identical semantics to the PyTorch CALayer."""
    y = jnp.mean(x, axis=(2, 3))                         # (N, C) global avg pool
    y = jnp.maximum(y @ w1.T + b1, 0.0)                  # 1x1 conv + ReLU
    y = y @ w2.T + b2                                    # 1x1 conv
    y = 1.0 / (1.0 + jnp.exp(-y))                        # Sigmoid
    return x * y[:, :, None, None]


if __name__ == "__main__":
    # Module config: CALayer(channel=32)  ->  squeeze channels = 32 // 8 = 4
    channel = 32
    reduced = channel // 8
    N, H, W = 2, 16, 16

    key = jax.random.PRNGKey(0)
    kx, kw1, kb1, kw2, kb2 = jax.random.split(key, 5)

    x = jax.random.normal(kx, (N, channel, H, W), dtype=jnp.float32)

    bound1 = 1.0 / (channel ** 0.5)                      # fan_in = channel * 1 * 1
    w1 = jax.random.uniform(kw1, (reduced, channel), minval=-bound1, maxval=bound1,
                            dtype=jnp.float32)
    b1 = jax.random.uniform(kb1, (reduced,), minval=-bound1, maxval=bound1,
                            dtype=jnp.float32)

    bound2 = 1.0 / (reduced ** 0.5)                      # fan_in = reduced * 1 * 1
    w2 = jax.random.uniform(kw2, (channel, reduced), minval=-bound2, maxval=bound2,
                            dtype=jnp.float32)
    b2 = jax.random.uniform(kb2, (channel,), minval=-bound2, maxval=bound2,
                            dtype=jnp.float32)

    out = ca_layer(x, w1, b1, w2, b2)
    out = jax.block_until_ready(out)

    ref = _reference_ca(x, w1, b1, w2, b2)
    assert out.shape == (N, channel, H, W), out.shape
    assert jnp.allclose(out, ref, atol=1e-5, rtol=1e-5), "mismatch vs reference"

    print("KERNEL_OK")
</pallas_src>

<mosaic_0001>
module attributes {stable_mosaic.version = 11 : i64} {
  func.func @_ca_kernel(%arg0: i32, %arg1: memref<2x32x256xf32, #tpu.memory_space<vmem>>, %arg2: memref<32x4xf32, #tpu.memory_space<vmem>>, %arg3: memref<1x4xf32, #tpu.memory_space<vmem>>, %arg4: memref<4x32xf32, #tpu.memory_space<vmem>>, %arg5: memref<1x32xf32, #tpu.memory_space<vmem>>, %arg6: memref<2x32x256xf32, #tpu.memory_space<vmem>>) attributes {dimension_semantics = [#tpu.dimension_semantics<parallel>], iteration_bounds = array<i64: 1>, scalar_prefetch = 0 : i64, scratch_operands = 0 : i64, tpu.core_type = #tpu.core_type<tc>, window_params = [{transform_indices = @transform_0, window_bounds = array<i64: 2, 32, 256>}, {pipeline_mode = #tpu.pipeline_mode<synchronous>, transform_indices = @transform_1, window_bounds = array<i64: 32, 4>}, {pipeline_mode = #tpu.pipeline_mode<synchronous>, transform_indices = @transform_2, window_bounds = array<i64: 1, 4>}, {pipeline_mode = #tpu.pipeline_mode<synchronous>, transform_indices = @transform_3, window_bounds = array<i64: 4, 32>}, {pipeline_mode = #tpu.pipeline_mode<synchronous>, transform_indices = @transform_4, window_bounds = array<i64: 1, 32>}, {transform_indices = @transform_5, window_bounds = array<i64: 2, 32, 256>}]} {
    %c0 = arith.constant 0 : index
    %c0_0 = arith.constant 0 : index
    %c0_1 = arith.constant 0 : index
    %0 = vector.load %arg1[%c0, %c0_0, %c0_1] : memref<2x32x256xf32, #tpu.memory_space<vmem>>, vector<2x32x256xf32>
    %cst = arith.constant dense<0.000000e+00> : vector<2x32xf32>
    %1 = vector.multi_reduction <add>, %0, %cst [2] : vector<2x32x256xf32> to vector<2x32xf32>
    %cst_2 = arith.constant 3.906250e-03 : f32
    %2 = vector.broadcast %cst_2 : f32 to vector<2x32xf32>
    %3 = arith.mulf %1, %2 : vector<2x32xf32>
    %c0_3 = arith.constant 0 : index
    %c0_4 = arith.constant 0 : index
    %4 = vector.load %arg2[%c0_3, %c0_4] : memref<32x4xf32, #tpu.memory_space<vmem>>, vector<32x4xf32>
    %cst_5 = arith.constant dense<0.000000e+00> : vector<2x4xf32>
    %5 = tpu.matmul %3, %4, %cst_5 {dimension_numbers = #tpu.dot_dimension_numbers<[1], [0], [0], [1], [0, 0, 1, 1], [], []>} : vector<2x32xf32>, vector<32x4xf32>, vector<2x4xf32> -> vector<2x4xf32>
    %c0_6 = arith.constant 0 : index
    %c0_7 = arith.constant 0 : index
    %6 = vector.load %arg3[%c0_6, %c0_7] : memref<1x4xf32, #tpu.memory_space<vmem>>, vector<1x4xf32>
    %7 = vector.broadcast %6 : vector<1x4xf32> to vector<2x4xf32>
    %8 = arith.addf %5, %7 : vector<2x4xf32>
    %cst_8 = arith.constant 0.000000e+00 : f32
    %9 = vector.broadcast %cst_8 : f32 to vector<2x4xf32>
    %10 = arith.maximumf %8, %9 : vector<2x4xf32>
    %c0_9 = arith.constant 0 : index
    %c0_10 = arith.constant 0 : index
    %11 = vector.load %arg4[%c0_9, %c0_10] : memref<4x32xf32, #tpu.memory_space<vmem>>, vector<4x32xf32>
    %cst_11 = arith.constant dense<0.000000e+00> : vector<2x32xf32>
    %12 = tpu.matmul %10, %11, %cst_11 {dimension_numbers = #tpu.dot_dimension_numbers<[1], [0], [0], [1], [0, 0, 1, 1], [], []>} : vector<2x4xf32>, vector<4x32xf32>, vector<2x32xf32> -> vector<2x32xf32>
    %c0_12 = arith.constant 0 : index
    %c0_13 = arith.constant 0 : index
    %13 = vector.load %arg5[%c0_12, %c0_13] : memref<1x32xf32, #tpu.memory_space<vmem>>, vector<1x32xf32>
    %14 = vector.broadcast %13 : vector<1x32xf32> to vector<2x32xf32>
    %15 = arith.addf %12, %14 : vector<2x32xf32>
    %cst_14 = arith.constant 0.000000e+00 : f32
    %16 = vector.broadcast %cst_14 : f32 to vector<2x32xf32>
    %17 = arith.subf %16, %15 : vector<2x32xf32>
    %18 = math.exp %17 : vector<2x32xf32>
    %cst_15 = arith.constant 1.000000e+00 : f32
    %19 = vector.broadcast %cst_15 : f32 to vector<2x32xf32>
    %20 = arith.addf %19, %18 : vector<2x32xf32>
    %cst_16 = arith.constant 1.000000e+00 : f32
    %21 = vector.broadcast %cst_16 : f32 to vector<2x32xf32>
    %22 = arith.divf %21, %20 : vector<2x32xf32>
    %23 = vector.shape_cast %22 : vector<2x32xf32> to vector<2x32x1xf32>
    %24 = vector.broadcast %23 : vector<2x32x1xf32> to vector<2x32x256xf32>
    %25 = arith.mulf %0, %24 : vector<2x32x256xf32>
    %c0_17 = arith.constant 0 : index
    %c0_18 = arith.constant 0 : index
    %c0_19 = arith.constant 0 : index
    %26 = vector.load %arg6[%c0_17, %c0_18, %c0_19] : memref<2x32x256xf32, #tpu.memory_space<vmem>>, vector<2x32x256xf32>
    tpu.vector_store %arg6[%c0_17, %c0_18, %c0_19], %25 {strides = array<i32>} : memref<2x32x256xf32, #tpu.memory_space<vmem>>, vector<2x32x256xf32>,
    return
  }
  func.func @transform_0(%arg0: i32) -> (i32, i32, i32) {
    %c0_i32 = arith.constant 0 : i32
    %c0_i32_0 = arith.constant 0 : i32
    %c0_i32_1 = arith.constant 0 : i32
    return %arg0, %c0_i32, %c0_i32_0 : i32, i32, i32
  }
  func.func @transform_1(%arg0: i32) -> (i32, i32) {
    %c0_i32 = arith.constant 0 : i32
    %c0_i32_0 = arith.constant 0 : i32
    %c0_i32_1 = arith.constant 0 : i32
    return %c0_i32, %c0_i32_0 : i32, i32
  }
  func.func @transform_2(%arg0: i32) -> (i32, i32) {
    %c0_i32 = arith.constant 0 : i32
    %c0_i32_0 = arith.constant 0 : i32
    %c0_i32_1 = arith.constant 0 : i32
    return %c0_i32, %c0_i32_0 : i32, i32
  }
  func.func @transform_3(%arg0: i32) -> (i32, i32) {
    %c0_i32 = arith.constant 0 : i32
    %c0_i32_0 = arith.constant 0 : i32
    %c0_i32_1 = arith.constant 0 : i32
    return %c0_i32, %c0_i32_0 : i32, i32
  }
  func.func @transform_4(%arg0: i32) -> (i32, i32) {
    %c0_i32 = arith.constant 0 : i32
    %c0_i32_0 = arith.constant 0 : i32
    %c0_i32_1 = arith.constant 0 : i32
    return %c0_i32, %c0_i32_0 : i32, i32
  }
  func.func @transform_5(%arg0: i32) -> (i32, i32, i32) {
    %c0_i32 = arith.constant 0 : i32
    %c0_i32_0 = arith.constant 0 : i32
    %c0_i32_1 = arith.constant 0 : i32
    return %arg0, %c0_i32, %c0_i32_0 : i32, i32, i32
  }
}

</mosaic_0001>

<bundles_post_ra>
// kernel: tpu_custom_call.1
= control target key start
LH: loop header
LB: loop body
LE: loop exit
PB: predicated region body
PF: predicated region fallthrough
CT: control target
= control target key end

     0   :  { %10 = vsyncpa [#allocation3], 0  ;;  %s507_s0 = inlined_call_operand.hbm [shape: f32[2,32,256], index: 0, kind: input, shape index: {}]   ;;  %s508_s1 = inlined_call_operand.vmem [shape: f32[32,4], index: 1, kind: input, shape index: {}]   ;;  %s509_s2 = inlined_call_operand.vmem [shape: f32[1,4], index: 2, kind: input, shape index: {}]   ;;  %s510_s3 = inlined_call_operand.vmem [shape: f32[4,32], index: 3, kind: input, shape index: {}]   ;;  %s511_s4 = inlined_call_operand.vmem [shape: f32[1,32], index: 4, kind: input, shape index: {}]   ;;  %s512_s5 = inlined_call_operand.hbm [shape: f32[2,32,256], index: 5, kind: output, shape index: {}]  }
   0x1   :  { %11 = vsyncpa [#allocation4], 0  ;;  %s16_s20 = sshll.u32 %s507_s0, 4  ;;  %s376_s21 = smov [#allocation2]   ;;  %s17_s20 = int_to_ptr.hbm [resolvable:$true] %s16_s20 }
   0x2   :  { %s18_s22 = sshll.u32 %s376_s21, 4  ;;  %s377_s23 = smov 256   ;;  %s19_s22 = int_to_ptr.vmem [resolvable:$true] %s18_s22 }
   0x3   :  { %s378_s24 = smov 16  }
   0x4   :  { %24 = dma.hbm_to_vmem [thread:$0]  %s17_s20, 2048, %s19_s22, [#allocation3], %s377_s23, %s377_s23, %s378_s24  }
   0x5   :  { %372 = dma.done.wait [#allocation3], 2048  }
   0x6   :  { %373 = vsyncadd [#allocation3], 4294965248  ;;  %v416_v0 = vld [vmem:[#allocation2 + $0x40] sm:$0xff]  ;;  %v418_v1 = vld [vmem:[#allocation2 + $0x48] sm:$0xff]  ;;  %v101_v31 = vlaneseq  ;;  %vm106_vm0 = vcmask 130112   ;;  %vm110_vm1 = vcmask 195712  }
   0x7   :  { %v420_v2 = vld [vmem:[#allocation2] sm:$0xff]  ;;  %v65_v3 = vadd.f32 %v418_v1, %v416_v0  ;;  %v424_v4 = vld [vmem:[#allocation2 + $0x8] sm:$0xff]  ;;  %v434_v9 = vld [vmem:[#allocation2 + $0x50] sm:$0xff]  ;;  %vm114_vm2 = vcmask 261312   ;;  %vm123_vm3 = vcmask 1041409   ;;  %vm125_vm4 = vcmask 261120  }
   0x8   :  { %v426_v5 = vld [vmem:[#allocation2 + $0x20] sm:$0xff]  ;;  %v428_v6 = vld [vmem:[#allocation2 + $0x28] sm:$0xff]  ;;  %v53_v7 = vadd.f32 %v424_v4, %v420_v2  ;;  %v436_v10 = vld [vmem:[#allocation2 + $0x58] sm:$0xff]  ;;  %v102_v32 = vand.u32 127, %v101_v31  ;;  %vm158_vm5 = vcmask 1043456   ;;  %vm154_vm6 = vcmask 31744  }
   0x9   :  { %v59_v8 = vadd.f32 %v428_v6, %v426_v5  ;;  %66 = vadd.xlane.f32.xlu1 %v65_v3  ;;  %v438_v11 = vld [vmem:[#allocation2 + $0x10] sm:$0xff]  ;;  %v440_v12 = vld [vmem:[#allocation2 + $0x18] sm:$0xff]  ;;  %v442_v13 = vld [vmem:[#allocation2 + $0x60] sm:$0xff]  ;;  %v68_v15 = vadd.f32 %v436_v10, %v434_v9  ;;  %s289_s13 = sshll.u32 %s512_s5, 4  ;;  %s290_s13 = int_to_ptr.hbm [resolvable:$true] %s289_s13 }
   0xa   :  { %54 = vadd.xlane.f32.xlu0 %v53_v7  ;;  %v444_v14 = vld [vmem:[#allocation2 + $0x68] sm:$0xff]  ;;  %v56_v16 = vadd.f32 %v440_v12, %v438_v11  ;;  %v452_v18 = vld [vmem:[#allocation2 + $0x70] sm:$0xff]  ;;  %v454_v19 = vld [vmem:[#allocation2 + $0x78] sm:$0xff]  ;;  %v104_v34 = vadd.s32 4294967288, %v102_v32  ;;  %v108_v43 = vadd.s32 4294967280, %v102_v32  ;;  %v112_v47 = vadd.s32 4294967272, %v102_v32 }
   0xb   :  { %60 = vadd.xlane.f32.xlu2 %v59_v8  ;;  %v71_v17 = vadd.f32 %v444_v14, %v442_v13  ;;  %v456_v20 = vld [vmem:[#allocation2 + $0x30] sm:$0xff]  ;;  %v458_v21 = vld [vmem:[#allocation2 + $0x38] sm:$0xff]  ;;  %v74_v22 = vadd.f32 %v454_v19, %v452_v18  ;;  %v86_v26 = vld [vmem:[%s508_s1 + $0x8] sm:$0xff] }
   0xc   :  { %v62_v23 = vadd.f32 %v458_v21, %v456_v20  ;;  %v88_v24 = vld [vmem:[%s508_s1 + $0x18] sm:$0xff]  ;;  %v87_v25 = vld [vmem:[%s508_s1 + $0x10] sm:$0xff]  ;;  %v85_v27 = vld [vmem:[%s508_s1] sm:$0xff] }
   0xd   :  { %140 = vmatpush.msra.mxu0 %v88_v24  ;;  %v149_v3 = vld [vmem:[%s510_s3] sm:$0xf] }
   0xe   :  { %303 = vmatpush.msk.msra.mxu1 %vm158_vm5, %v149_v3  ;;  %v318_v7 = vld [vmem:[%s509_s2] ss:$0 sm:$0xff]  ;;  %s379_s2 = smov [#allocation5]  }
   0xf   :  { %141 = vmatpush.msra.mxu0 %v87_v25  ;;  %v319_v24 = vld [vmem:[%s511_s4] ss:$0 sm:$0xff]  ;;  %s287_s3 = sshll.u32 %s379_s2, 4  ;;  %s288_s3 = int_to_ptr.vmem [resolvable:$true] %s287_s3 }
  0x11   :  { %69 = vadd.xlane.f32.xlu1 %v68_v15  ;;  %142 = vmatpush.msra.mxu0 %v86_v26 }
  0x12   :  { %57 = vadd.xlane.f32.xlu0 %v56_v16 }
  0x13   :  { %72 = vadd.xlane.f32.xlu2 %v71_v17  ;;  %143 = vmatpush.msra.mxu0 %v85_v27  ;;  %v203_v17 = vshrl.u32 %v101_v31, 7 }
  0x15   :  { %309 = vset.pattern.permute.xlu2 %v203_v17 }
  0x19   :  { %75 = vadd.xlane.f32.xlu1 %v74_v22  ;;  %v216_v22 = vadd.s32 16, %v203_v17 }
  0x1a   :  { %63 = vadd.xlane.f32.xlu0 %v62_v23  ;;  %v210_v23 = vadd.s32 8, %v203_v17 }
  0x1b   :  { %311 = vset.pattern.permute.xlu1 %v216_v22 }
  0x1c   :  { %310 = vset.pattern.permute.xlu0 %v210_v23 }
  0x7c   :  { %v67_v28 = vpop.xlane.xlu1 %66 }
  0x7d   :  { %v55_v29 = vpop.xlane.xlu0 %54  ;;  %v81_v39 = vmul.f32 0.00390625, %v67_v28 }
  0x7e   :  { %v61_v30 = vpop.xlane.xlu2 %60  ;;  %v77_v40 = vmul.f32 0.00390625, %v55_v29 }
  0x7f   :  { %v116_v45 = vperm.slane %v81_v39, %v102_v32  ;;  %v79_v46 = vmul.f32 0.00390625, %v61_v30 }
  0x80   :  { %v103_v48 = vperm.slane %v77_v40, %v102_v32 }
  0x81   :  { %v109_v56 = vperm.slane %v79_v46, %v108_v43 }
  0x84   :  { %v70_v33 = vpop.xlane.xlu1 %69 }
  0x85   :  { %v82_v35 = vmul.f32 0.00390625, %v70_v33  ;;  %v58_v36 = vpop.xlane.xlu0 %57 }
  0x86   :  { %v73_v37 = vpop.xlane.xlu2 %72  ;;  %v78_v38 = vmul.f32 0.00390625, %v58_v36 }
  0x87   :  { %v83_v41 = vmul.f32 0.00390625, %v73_v37  ;;  %v117_v42 = vperm.slane %v82_v35, %v104_v34 }
  0x88   :  { %v105_v44 = vperm.slane %v78_v38, %v104_v34 }
  0x89   :  { %v119_v49 = vperm.slane %v83_v41, %v108_v43  ;;  %v118_v51 = vsel %vm106_vm0, %v117_v42, %v116_v45  ;;  %v222_v42 = vadd.s32 24, %v203_v17 }
  0x8a   :  { %v107_v54 = vsel %vm106_vm0, %v105_v44, %v103_v48 }
  0x8b   :  { %v120_v59 = vsel %vm110_vm1, %v119_v49, %v118_v51  ;;  %v111_v60 = vsel %vm110_vm1, %v109_v56, %v107_v54 }
  0x8c   :  { %v76_v50 = vpop.xlane.xlu1 %75 }
  0x8d   :  { %v84_v52 = vmul.f32 0.00390625, %v76_v50  ;;  %v64_v53 = vpop.xlane.xlu0 %63 }
  0x8e   :  { %v80_v55 = vmul.f32 0.00390625, %v64_v53 }
  0x8f   :  { %v121_v57 = vperm.slane %v84_v52, %v112_v47 }
  0x90   :  { %v113_v58 = vperm.slane %v80_v55, %v112_v47 }
  0x91   :  { %v122_v61 = vsel %vm114_vm2, %v121_v57, %v120_v59 }
  0x92   :  { %v115_v62 = vsel %vm114_vm2, %v113_v58, %v111_v60 }
  0x93   :  { %v124_v63 = vsel %vm123_vm3, %v122_v61, %v115_v62 }
  0x94   :  { %302 = vmatmul.msk.f32.vlgmr.msra.gmra.mxu0 %vm125_vm4, %v124_v63 }
 0x111   :  { %v145_v8 = vpop.f32.mrf.mxu0 }
 0x112   :  { %v146_v15 = vadd.f32 %v318_v7, %v145_v8 }
 0x114   :  { %v148_v16 = vmax.f32 %v146_v15, 0.0 }
 0x116   :  { %304 = vmatmul.msk.f32.vlgmr.msra.gmra.mxu1 %vm154_vm6, %v148_v16 }
 0x193   :  { %v179_v25 = vpop.f32.mrf.mxu1 }
 0x194   :  { %v180_v26 = vadd.f32 %v319_v24, %v179_v25 }
 0x196   :  { %v182_v27 = vsub.f32 0.0, %v180_v26 }
 0x198   :  { %v183_v28 = vmul.f32 1.442695, %v182_v27 }
 0x19a   :  { %320 = vpow2.f32 %v183_v28 }
 0x1a0   :  { %v321_v29 = vpop.eup %320 }
 0x1a1   :  { %v185_v30 = vadd.f32 1.0, %v321_v29 }
 0x1a3   :  { %322 = vrcp.f32 %v185_v30  ;;  %v197_v34 = vand.u32 2147483648, %v185_v30  ;;  %v195_v36 = vand.u32 2147483647, %v185_v30  ;;  %vm191_vm8 = vweird.f32 %v185_v30 }
 0x1a5   :  { %v198_v38 = vor.u32 1.1754944e-38, %v197_v34  ;;  %vm196_vm10 = vcmp.eq.f32.partialorder %v195_v36, 8.507059e+37 }
 0x1a9   :  { %v323_v32 = vpop.eup %322 }
 0x1aa   :  { %v187_v33 = vmul.f32 %v323_v32, %v185_v30  ;;  %vm192_vm7 = vweird.f32 %v323_v32 }
 0x1ab   :  { %vm193_vm9 = vmor %vm191_vm8, %vm192_vm7 }
 0x1ac   :  { %v188_v31 = vsub.f32 1.0, %v187_v33 }
 0x1ae   :  { %v189_v35 = vmul.f32 %v323_v32, %v188_v31 }
 0x1b0   :  { %v190_v37 = vadd.f32 %v323_v32, %v189_v35 }
 0x1b2   :  { %v194_v39 = vsel %vm193_vm9, %v323_v32, %v190_v37 }
 0x1b3   :  { %v199_v40 = vsel %vm196_vm10, %v198_v38, %v194_v39 }
 0x1b4   :  { %v201_v41 = vperm.slane %v199_v40, 0  ;;  %v226_v43 = vperm.slane %v199_v40, 1 }
 0x1b6   :  { %218 = vperm.xlu1 %311, %v201_v41   ;;  %212 = vperm.xlu0 %310, %v201_v41  }
 0x1b7   :  { %206 = vperm.xlu2 %309, %v201_v41  }
 0x1be   :  { %314 = vset.pattern.permute.xlu1 %v210_v23  ;;  %317 = vset.pattern.permute.xlu0 %v222_v42 }
 0x1bf   :  { %312 = vset.pattern.permute.xlu2 %v222_v42 }
 0x1c6   :  { %237 = vperm.xlu1 %314, %v226_v43  }
 0x1c7   :  { %224 = vperm.xlu2 %312, %v201_v41  }
 0x1ce   :  { %316 = vset.pattern.permute.xlu1 %v222_v42 }
 0x1cf   :  { %313 = vset.pattern.permute.xlu2 %v203_v17 }
 0x1d6   :  { %249 = vperm.xlu1 %316, %v226_v43  }
 0x1d7   :  { %231 = vperm.xlu2 %313, %v226_v43  }
 0x1df   :  { %315 = vset.pattern.permute.xlu2 %v216_v22 }
 0x1e7   :  { %243 = vperm.xlu2 %315, %v226_v43  }
 0x211   :  { %v207_v44 = vpop.permute.xlu2 %206 }
 0x212   :  { %v251_v45 = vmul.f32 %v207_v44, %v420_v2  ;;  %v252_v46 = vmul.f32 %v207_v44, %v424_v4 }
 0x214   :  { %267 = vst [vmem:[#allocation5] sm:$0xff] %v251_v45 }
 0x215   :  { %268 = vst [vmem:[#allocation5 + $0x8] sm:$0xff] %v252_v46 }
 0x221   :  { %v225_v47 = vpop.permute.xlu2 %224 }
 0x222   :  { %v257_v48 = vmul.f32 %v225_v47, %v456_v20  ;;  %v258_v49 = vmul.f32 %v225_v47, %v458_v21 }
 0x224   :  { %273 = vst [vmem:[#allocation5 + $0x30] sm:$0xff] %v257_v48 }
 0x225   :  { %274 = vst [vmem:[#allocation5 + $0x38] sm:$0xff] %v258_v49 }
 0x228   :  { %v219_v50 = vpop.permute.xlu1 %218  ;;  %v213_v51 = vpop.permute.xlu0 %212 }
 0x229   :  { %v255_v52 = vmul.f32 %v219_v50, %v426_v5  ;;  %v256_v53 = vmul.f32 %v219_v50, %v428_v6  ;;  %v253_v54 = vmul.f32 %v213_v51, %v438_v11  ;;  %v254_v2 = vmul.f32 %v213_v51, %v440_v12 }
 0x22b   :  { %271 = vst [vmem:[#allocation5 + $0x20] sm:$0xff] %v255_v52 }
 0x22c   :  { %272 = vst [vmem:[#allocation5 + $0x28] sm:$0xff] %v256_v53 }
 0x22d   :  { %269 = vst [vmem:[#allocation5 + $0x10] sm:$0xff] %v253_v54 }
 0x22e   :  { %270 = vst [vmem:[#allocation5 + $0x18] sm:$0xff] %v254_v2 }
 0x231   :  { %v232_v4 = vpop.permute.xlu2 %231 }
 0x232   :  { %v259_v20 = vmul.f32 %v232_v4, %v416_v0  ;;  %v260_v21 = vmul.f32 %v232_v4, %v418_v1 }
 0x234   :  { %275 = vst [vmem:[#allocation5 + $0x40] sm:$0xff] %v259_v20 }
 0x235   :  { %276 = vst [vmem:[#allocation5 + $0x48] sm:$0xff] %v260_v21 }
 0x238   :  { %v238_v55 = vpop.permute.xlu1 %237 }
 0x239   :  { %v261_v5 = vmul.f32 %v238_v55, %v434_v9  ;;  %v262_v6 = vmul.f32 %v238_v55, %v436_v10 }
 0x23b   :  { %277 = vst [vmem:[#allocation5 + $0x50] sm:$0xff] %v261_v5 }
 0x23c   :  { %278 = vst [vmem:[#allocation5 + $0x58] sm:$0xff] %v262_v6 }
 0x241   :  { %v244_v11 = vpop.permute.xlu2 %243 }
 0x242   :  { %v263_v12 = vmul.f32 %v244_v11, %v442_v13  ;;  %v264_v56 = vmul.f32 %v244_v11, %v444_v14 }
 0x244   :  { %279 = vst [vmem:[#allocation5 + $0x60] sm:$0xff] %v263_v12 }
 0x245   :  { %280 = vst [vmem:[#allocation5 + $0x68] sm:$0xff] %v264_v56 }
 0x248   :  { %v250_v0 = vpop.permute.xlu1 %249 }
 0x249   :  { %v265_v1 = vmul.f32 %v250_v0, %v452_v18  ;;  %v266_v9 = vmul.f32 %v250_v0, %v454_v19 }
 0x24b   :  { %281 = vst [vmem:[#allocation5 + $0x70] sm:$0xff] %v265_v1 }
 0x24c   :  { %282 = vst [vmem:[#allocation5 + $0x78] sm:$0xff] %v266_v9 }
 0x24d   :  { %295 = dma.vmem_to_hbm [thread:$0]  %s288_s3, 2048, %s290_s13, [#allocation4], %s377_s23, %s377_s23, %s378_s24  }
 0x24e   :  { %374 = dma.done.wait [#allocation4], 2048  }
 0x24f   :  { %375 = vsyncadd [#allocation4], 4294965248 }
 0x250   :  { %300 = vsyncpa [#allocation3], 1 }
 0x251   :  { %301 = vsyncpa [#allocation4], 1 }

</bundles_post_ra>
